<compile_context>
chip_gen: v7x
topology: tpu7x:2x2x1
jax: 0.10.0
libtpu: 0.0.40
codegen_flags: <defaults>
</compile_context>

<pallas_src>
import functools

import jax
import jax.numpy as jnp
from jax import lax
from jax.experimental import pallas as pl
from jax.experimental.pallas import tpu as pltpu


def _round_up(x, m):
    return ((x + m - 1) // m) * m


def _fused_body(x_ref, halo_ref, wq_ref, bf_ref, o_ref, win_ref, *, Qn, L_TILE):
    # x_ref:    (1, Cg, L_TILE)        phase-major input tile (Cg = stride * C_inp)
    # halo_ref: (1, Cg, 128) | None    next 128 phase positions (tap overhang)
    # wq_ref:   (Qn, C_outp, Cg)       fused depthwise*pointwise weights
    # bf_ref:   (C_outp, 1)            fused bias = Wpw @ b_dw + b_pw (f32)
    # o_ref:    (1, C_outp, L_TILE)    lane-dense output tile
    # win_ref:  (Cg, L_TILE + 128)     VMEM scratch window (only when halo present)
    w_dtype = wq_ref.dtype

    if halo_ref is not None:
        # Stitch main tile + halo once; all tap-group reads come from this window.
        win_ref[:, :L_TILE] = x_ref[0]
        win_ref[:, L_TILE:] = halo_ref[0]

    def tap(q):
        if halo_ref is None:
            xs = x_ref[0]                       # Qn == 1: the whole tile, aligned
        else:
            xs = win_ref[:, q:q + L_TILE]       # small static shift; K is small
        if xs.dtype != w_dtype:
            xs = xs.astype(w_dtype)
        return jnp.dot(wq_ref[q], xs, preferred_element_type=jnp.float32)

    acc = tap(0)
    for q in range(1, Qn):                      # static, unrolled
        acc = acc + tap(q)
    o_ref[0] = (acc + bf_ref[...]).astype(o_ref.dtype)


def depthwise_separable_conv1d(x, w_dw, b_dw, w_pw, b_pw, *, stride=1, padding=0):
    """x: (N, C_in, L); w_dw: (C_in, 1, K); b_dw: (C_in,); w_pw: (C_out, C_in, 1); b_pw: (C_out,)."""
    N, C_in, L = x.shape
    K = w_dw.shape[-1]
    C_out = w_pw.shape[0]
    L_out = (L + 2 * padding - K) // stride + 1
    assert L_out > 0, "empty output length"

    Qn = -(-K // stride)                     # number of fused tap-group matmuls
    assert Qn <= 129, "kernel taps exceed the 128-wide halo"

    # MXU operand dtype and packed-sublane channel padding.
    mxu_dtype = jnp.bfloat16 if x.dtype == jnp.bfloat16 else jnp.float32
    c_mult = 16 if mxu_dtype == jnp.bfloat16 else 8
    C_inp = _round_up(C_in, c_mult)
    C_outp = _round_up(C_out, c_mult)
    Cg = stride * C_inp                      # phase-major rows per contraction

    in_bytes = x.dtype.itemsize
    w_bytes = 2 if mxu_dtype == jnp.bfloat16 else 4

    def vmem_usage(lt):
        use = 2 * Cg * lt * in_bytes                   # main input block (double buffered)
        use += 2 * C_outp * lt * in_bytes              # output tile (double buffered)
        use += 2 * Qn * C_outp * Cg * w_bytes          # weights
        use += 2 * C_outp * 128 * 4                    # bias (lane padded)
        if Qn > 1:
            use += 2 * Cg * 128 * in_bytes             # halo block
            use += Cg * (lt + 128) * in_bytes          # window scratch
        use += C_outp * lt * 4                         # f32 accumulator
        use += 2 * Cg * lt * max(in_bytes, w_bytes)    # slice/relayout temporaries headroom
        return use

    # Lane-dense output tiling: multiple of 128, as large as the VMEM budget admits.
    # TODO(synk): raise the budget/limit further on 128 MiB parts (v5e/v6e) via get_tpu_info.
    VMEM_BUDGET = 40 * 1024 * 1024
    L_TILE = min(1024, _round_up(L_out, 128))
    while vmem_usage(L_TILE) > VMEM_BUDGET and L_TILE > 128:
        L_TILE = max(128, _round_up(L_TILE // 2, 128))

    T = -(-L_out // L_TILE)
    L_out_pad = T * L_TILE
    L_ph = T * L_TILE + (128 if Qn > 1 else 0)    # phase-space length incl. halo room
    L_full = stride * L_ph

    # Conv `padding` zeros on the left; pad-or-truncate on the right so the phase
    # deinterleave reshape is exact (padded-tail outputs are stripped at the end).
    right = max(0, L_full - padding - L)
    x_full = jnp.pad(x, ((0, 0), (0, C_inp - C_in), (padding, right)))[:, :, :L_full]
    # Phase-major deinterleave: x_ph[n, p*C_inp + ci, m] = x_full[n, ci, m*stride + p].
    x_ph = (x_full.reshape(N, C_inp, L_ph, stride)
            .transpose(0, 3, 1, 2)
            .reshape(N, Cg, L_ph))

    # Fold depthwise weights into the pointwise matmul, and the depthwise bias into the
    # pointwise bias (all hoisted; cast once to the MXU dtype).
    wdw_f = w_dw.reshape(C_in, K).astype(jnp.float32)
    wpw_f = w_pw.reshape(C_out, C_in).astype(jnp.float32)
    w2 = wpw_f[:, :, None] * wdw_f[None, :, :]                       # (C_out, C_in, K)
    w2 = jnp.pad(w2, ((0, 0), (0, 0), (0, Qn * stride - K)))
    w2 = w2.reshape(C_out, C_in, Qn, stride).transpose(2, 0, 3, 1)   # (Qn, C_out, stride, C_in)
    wq = jnp.zeros((Qn, C_outp, stride, C_inp), jnp.float32)
    wq = wq.at[:, :C_out, :, :C_in].set(w2).reshape(Qn, C_outp, Cg).astype(mxu_dtype)

    b_fused = wpw_f @ b_dw.astype(jnp.float32) + b_pw.astype(jnp.float32)
    bf = jnp.zeros((C_outp, 1), jnp.float32).at[:C_out, 0].set(b_fused)

    main_spec = pl.BlockSpec((1, Cg, L_TILE), lambda n, t: (n, 0, t))
    wq_spec = pl.BlockSpec((Qn, C_outp, Cg), lambda n, t: (0, 0, 0))
    bf_spec = pl.BlockSpec((C_outp, 1), lambda n, t: (0, 0))
    out_spec = pl.BlockSpec((1, C_outp, L_TILE), lambda n, t: (n, 0, t))

    body = functools.partial(_fused_body, Qn=Qn, L_TILE=L_TILE)
    if Qn > 1:
        tb = L_TILE // 128
        halo_spec = pl.BlockSpec((1, Cg, 128), lambda n, t, tb=tb: (n, 0, (t + 1) * tb))
        in_specs = [main_spec, halo_spec, wq_spec, bf_spec]
        scratch_shapes = [pltpu.VMEM((Cg, L_TILE + 128), x.dtype)]
        operands = (x_ph, x_ph, wq, bf)

        def kernel(x_ref, halo_ref, wq_ref, bf_ref, o_ref, win_ref):
            body(x_ref, halo_ref, wq_ref, bf_ref, o_ref, win_ref)
    else:
        in_specs = [main_spec, wq_spec, bf_spec]
        scratch_shapes = []
        operands = (x_ph, wq, bf)

        def kernel(x_ref, wq_ref, bf_ref, o_ref):
            body(x_ref, None, wq_ref, bf_ref, o_ref, None)

    vmem_limit = min(48 * 1024 * 1024,
                     max(32 * 1024 * 1024, int(vmem_usage(L_TILE) * 1.25) + (2 << 20)))
    # Megacore: shard batch; only fall back to t-parallel when there is a single batch.
    dims = ("parallel", "arbitrary") if N >= 2 else ("parallel", "parallel")

    out = pl.pallas_call(
        kernel,
        out_shape=jax.ShapeDtypeStruct((N, C_outp, L_out_pad), x.dtype),
        grid_spec=pltpu.PrefetchScalarGridSpec(
            num_scalar_prefetch=0,
            grid=(N, T),
            in_specs=in_specs,
            out_specs=out_spec,
            scratch_shapes=scratch_shapes,
        ),
        compiler_params=pltpu.CompilerParams(
            dimension_semantics=dims,
            vmem_limit_bytes=vmem_limit,
        ),
    )(*operands)

    # Strip channel / length padding added for alignment.
    return out[:, :C_out, :L_out]


def _reference(x, w_dw, b_dw, w_pw, b_pw, *, stride, padding):
    # Pure-JAX reference matching PyTorch Conv1d semantics.
    C_in = x.shape[1]
    y = lax.conv_general_dilated(
        x, w_dw, window_strides=(stride,), padding=[(padding, padding)],
        dimension_numbers=("NCH", "OIH", "NCH"), feature_group_count=C_in)
    y = y + b_dw[None, :, None]
    z = lax.conv_general_dilated(
        y, w_pw, window_strides=(1,), padding=[(0, 0)],
        dimension_numbers=("NCH", "OIH", "NCH"))
    return z + b_pw[None, :, None]


def _make_params(key, C_in, C_out, K):
    k1, k2, k3, k4 = jax.random.split(key, 4)
    bound_dw = 1.0 / (1 * K) ** 0.5
    w_dw = jax.random.uniform(k1, (C_in, 1, K), minval=-bound_dw, maxval=bound_dw, dtype=jnp.float32)
    b_dw = jax.random.uniform(k2, (C_in,), minval=-bound_dw, maxval=bound_dw, dtype=jnp.float32)
    bound_pw = 1.0 / (C_in * 1) ** 0.5
    w_pw = jax.random.uniform(k3, (C_out, C_in, 1), minval=-bound_pw, maxval=bound_pw, dtype=jnp.float32)
    b_pw = jax.random.uniform(k4, (C_out,), minval=-bound_pw, maxval=bound_pw, dtype=jnp.float32)
    return w_dw, b_dw, w_pw, b_pw


if __name__ == "__main__":
    key = jax.random.PRNGKey(0)

    configs = [
        # Module-sized shapes (stride-1 path) and a strided config (phase-deinterleave path).
        dict(N=2, C_in=4, C_out=8, L=16, K=3, stride=1, padding=1),
        dict(N=2, C_in=6, C_out=10, L=40, K=5, stride=2, padding=2),
    ]
    for cfg in configs:
        key, kx, kp = jax.random.split(key, 3)
        x = jax.random.normal(kx, (cfg["N"], cfg["C_in"], cfg["L"]), dtype=jnp.float32)
        w_dw, b_dw, w_pw, b_pw = _make_params(kp, cfg["C_in"], cfg["C_out"], cfg["K"])

        out = depthwise_separable_conv1d(x, w_dw, b_dw, w_pw, b_pw,
                                         stride=cfg["stride"], padding=cfg["padding"])
        out = jax.block_until_ready(out)

        ref = _reference(x, w_dw, b_dw, w_pw, b_pw, stride=cfg["stride"], padding=cfg["padding"])
        assert out.shape == ref.shape, (out.shape, ref.shape)
        err = float(jnp.max(jnp.abs(out - ref)))
        # f32 self-test (bf16 path would need a looser tolerance due to MXU rounding).
        assert jnp.allclose(out, ref, atol=3e-5, rtol=3e-5), err

    print("KERNEL_OK")
</pallas_src>

<mosaic_0001>
module attributes {stable_mosaic.version = 11 : i64} {
  func.func @kernel(%arg0: i32, %arg1: i32, %arg2: memref<1x8x128xf32, #tpu.memory_space<vmem>>, %arg3: memref<1x8x128xf32, #tpu.memory_space<vmem>>, %arg4: memref<3x8x8xf32, #tpu.memory_space<vmem>>, %arg5: memref<8x1xf32, #tpu.memory_space<vmem>>, %arg6: memref<1x8x128xf32, #tpu.memory_space<vmem>>, %arg7: memref<8x256xf32, #tpu.memory_space<vmem>>) attributes {dimension_semantics = [#tpu.dimension_semantics<parallel>, #tpu.dimension_semantics<arbitrary>], iteration_bounds = array<i64: 2, 1>, scalar_prefetch = 0 : i64, scratch_operands = 1 : i64, tpu.core_type = #tpu.core_type<tc>, window_params = [{transform_indices = @transform_0, window_bounds = array<i64: 1, 8, 128>}, {transform_indices = @transform_1, window_bounds = array<i64: 1, 8, 128>}, {pipeline_mode = #tpu.pipeline_mode<synchronous>, transform_indices = @transform_2, window_bounds = array<i64: 3, 8, 8>}, {pipeline_mode = #tpu.pipeline_mode<synchronous>, transform_indices = @transform_3, window_bounds = array<i64: 8, 1>}, {transform_indices = @transform_4, window_bounds = array<i64: 1, 8, 128>}]} {
    %c0 = arith.constant 0 : index
    %c0_0 = arith.constant 0 : index
    %c0_1 = arith.constant 0 : index
    %0 = vector.load %arg2[%c0, %c0_0, %c0_1] : memref<1x8x128xf32, #tpu.memory_space<vmem>>, vector<1x8x128xf32>
    %1 = vector.shape_cast %0 : vector<1x8x128xf32> to vector<8x128xf32>
    %c0_2 = arith.constant 0 : index
    %c0_3 = arith.constant 0 : index
    %2 = vector.load %arg7[%c0_2, %c0_3] : memref<8x256xf32, #tpu.memory_space<vmem>>, vector<8x128xf32>
    tpu.vector_store %arg7[%c0_2, %c0_3], %1 {strides = array<i32>} : memref<8x256xf32, #tpu.memory_space<vmem>>, vector<8x128xf32>,
    %c0_4 = arith.constant 0 : index
    %c0_5 = arith.constant 0 : index
    %c0_6 = arith.constant 0 : index
    %3 = vector.load %arg3[%c0_4, %c0_5, %c0_6] : memref<1x8x128xf32, #tpu.memory_space<vmem>>, vector<1x8x128xf32>
    %4 = vector.shape_cast %3 : vector<1x8x128xf32> to vector<8x128xf32>
    %c0_7 = arith.constant 0 : index
    %c128 = arith.constant 128 : index
    %5 = vector.load %arg7[%c0_7, %c128] : memref<8x256xf32, #tpu.memory_space<vmem>>, vector<8x128xf32>
    tpu.vector_store %arg7[%c0_7, %c128], %4 {strides = array<i32>} : memref<8x256xf32, #tpu.memory_space<vmem>>, vector<8x128xf32>,
    %c0_8 = arith.constant 0 : index
    %c0_9 = arith.constant 0 : index
    %6 = vector.load %arg7[%c0_8, %c0_9] : memref<8x256xf32, #tpu.memory_space<vmem>>, vector<8x128xf32>
    %c0_10 = arith.constant 0 : index
    %c0_11 = arith.constant 0 : index
    %c0_12 = arith.constant 0 : index
    %7 = vector.load %arg4[%c0_10, %c0_11, %c0_12] : memref<3x8x8xf32, #tpu.memory_space<vmem>>, vector<1x8x8xf32>
    %8 = vector.shape_cast %7 : vector<1x8x8xf32> to vector<8x8xf32>
    %cst = arith.constant dense<0.000000e+00> : vector<8x128xf32>
    %9 = tpu.matmul %8, %6, %cst {dimension_numbers = #tpu.dot_dimension_numbers<[1], [0], [0], [1], [0, 0, 1, 1], [], []>} : vector<8x8xf32>, vector<8x128xf32>, vector<8x128xf32> -> vector<8x128xf32>
    %c0_13 = arith.constant 0 : index
    %c1 = arith.constant 1 : index
    %10 = vector.load %arg7[%c0_13, %c1] : memref<8x256xf32, #tpu.memory_space<vmem>>, vector<8x128xf32>
    %c1_14 = arith.constant 1 : index
    %c0_15 = arith.constant 0 : index
    %c0_16 = arith.constant 0 : index
    %11 = vector.load %arg4[%c1_14, %c0_15, %c0_16] : memref<3x8x8xf32, #tpu.memory_space<vmem>>, vector<1x8x8xf32>
    %12 = vector.shape_cast %11 : vector<1x8x8xf32> to vector<8x8xf32>
    %cst_17 = arith.constant dense<0.000000e+00> : vector<8x128xf32>
    %13 = tpu.matmul %12, %10, %cst_17 {dimension_numbers = #tpu.dot_dimension_numbers<[1], [0], [0], [1], [0, 0, 1, 1], [], []>} : vector<8x8xf32>, vector<8x128xf32>, vector<8x128xf32> -> vector<8x128xf32>
    %14 = arith.addf %9, %13 : vector<8x128xf32>
    %c0_18 = arith.constant 0 : index
    %c2 = arith.constant 2 : index
    %15 = vector.load %arg7[%c0_18, %c2] : memref<8x256xf32, #tpu.memory_space<vmem>>, vector<8x128xf32>
    %c2_19 = arith.constant 2 : index
    %c0_20 = arith.constant 0 : index
    %c0_21 = arith.constant 0 : index
    %16 = vector.load %arg4[%c2_19, %c0_20, %c0_21] : memref<3x8x8xf32, #tpu.memory_space<vmem>>, vector<1x8x8xf32>
    %17 = vector.shape_cast %16 : vector<1x8x8xf32> to vector<8x8xf32>
    %cst_22 = arith.constant dense<0.000000e+00> : vector<8x128xf32>
    %18 = tpu.matmul %17, %15, %cst_22 {dimension_numbers = #tpu.dot_dimension_numbers<[1], [0], [0], [1], [0, 0, 1, 1], [], []>} : vector<8x8xf32>, vector<8x128xf32>, vector<8x128xf32> -> vector<8x128xf32>
    %19 = arith.addf %14, %18 : vector<8x128xf32>
    %c0_23 = arith.constant 0 : index
    %c0_24 = arith.constant 0 : index
    %20 = vector.load %arg5[%c0_23, %c0_24] : memref<8x1xf32, #tpu.memory_space<vmem>>, vector<8x1xf32>
    %21 = vector.broadcast %20 : vector<8x1xf32> to vector<8x128xf32>
    %22 = arith.addf %19, %21 : vector<8x128xf32>
    %c0_25 = arith.constant 0 : index
    %c0_26 = arith.constant 0 : index
    %c0_27 = arith.constant 0 : index
    %23 = vector.load %arg6[%c0_25, %c0_26, %c0_27] : memref<1x8x128xf32, #tpu.memory_space<vmem>>, vector<1x8x128xf32>
    %24 = vector.shape_cast %23 : vector<1x8x128xf32> to vector<8x128xf32>
    %25 = vector.shape_cast %22 : vector<8x128xf32> to vector<1x8x128xf32>
    tpu.vector_store %arg6[%c0_25, %c0_26, %c0_27], %25 {strides = array<i32>} : memref<1x8x128xf32, #tpu.memory_space<vmem>>, vector<1x8x128xf32>,
    return
  }
  func.func @transform_0(%arg0: i32, %arg1: i32) -> (i32, i32, i32) {
    %c0_i32 = arith.constant 0 : i32
    %c0_i32_0 = arith.constant 0 : i32
    return %arg0, %c0_i32, %arg1 : i32, i32, i32
  }
  func.func @transform_1(%arg0: i32, %arg1: i32) -> (i32, i32, i32) {
    %c1_i32 = arith.constant 1 : i32
    %0 = arith.addi %arg1, %c1_i32 : i32
    %c1_i32_0 = arith.constant 1 : i32
    %1 = arith.muli %0, %c1_i32_0 : i32
    %c0_i32 = arith.constant 0 : i32
    %c0_i32_1 = arith.constant 0 : i32
    return %arg0, %c0_i32, %1 : i32, i32, i32
  }
  func.func @transform_2(%arg0: i32, %arg1: i32) -> (i32, i32, i32) {
    %c0_i32 = arith.constant 0 : i32
    %c0_i32_0 = arith.constant 0 : i32
    %c0_i32_1 = arith.constant 0 : i32
    %c0_i32_2 = arith.constant 0 : i32
    return %c0_i32, %c0_i32_0, %c0_i32_1 : i32, i32, i32
  }
  func.func @transform_3(%arg0: i32, %arg1: i32) -> (i32, i32) {
    %c0_i32 = arith.constant 0 : i32
    %c0_i32_0 = arith.constant 0 : i32
    %c0_i32_1 = arith.constant 0 : i32
    return %c0_i32, %c0_i32_0 : i32, i32
  }
  func.func @transform_4(%arg0: i32, %arg1: i32) -> (i32, i32, i32) {
    %c0_i32 = arith.constant 0 : i32
    %c0_i32_0 = arith.constant 0 : i32
    return %arg0, %c0_i32, %arg1 : i32, i32, i32
  }
}

</mosaic_0001>

<bundles_post_ra>
// kernel: tpu_custom_call.1
= control target key start
LH: loop header
LB: loop body
LE: loop exit
PB: predicated region body
PF: predicated region fallthrough
CT: control target
= control target key end

     0   :  { %s1290_s0 = inlined_call_operand.hbm [shape: f32[2,8,256], index: 0, kind: input, shape index: {}]   ;;  %s1291_s1 = inlined_call_operand.hbm [shape: f32[2,8,256], index: 1, kind: input, shape index: {}]   ;;  %s1292_s2 = inlined_call_operand.hbm [shape: f32[3,8,8], index: 2, kind: input, shape index: {}]   ;;  %s1293_s3 = inlined_call_operand.vmem [shape: f32[8,1], index: 3, kind: input, shape index: {}]   ;;  %s1294_s4 = inlined_call_operand.hbm [shape: f32[2,8,128], index: 4, kind: output, shape index: {}]  }
   0x1   :  { %1301 = sst [smem:[#allocation16_spill]] %s1292_s2 }
   0x2   :  { %9 = vsyncpa [#allocation4], 0 }
   0x3   :  { %11 = vsyncpa [#allocation4 + $0x1], 0 }
   0x4   :  { %12 = vsyncpa [#allocation7], 0 }
   0x5   :  { %14 = vsyncpa [#allocation7 + $0x1], 0 }
   0x6   :  { %15 = vsyncpa [#allocation5], 0 }
   0x7   :  { %17 = vsyncpa [#allocation5 + $0x1], 0  ;;  %s1027_s15 = smov 0   ;;  %s1029_s16 = smov 0  }
   0x8   :  { %s1031_s17 = smov 0   ;;  %s1033_s18 = smov 0  }
   0x9   :  { %s1035_s19 = smov 0   ;;  %s1037_s20 = smov 0  }
   0xa LB: > { %1302 = sst [smem:[#allocation14_spill]] %s985_s19  ;;  %s1058_s21 = sadd.s32 4294967295, %s989_s20   ;;  %s989_s20 = sphi %s1037_s20, %s23_s20   ;;  %s985_s19 = sphi %s1035_s19, %s1321_s19   ;;  %s981_s18 = sphi %s1033_s18, %s1320_s18   ;;  %s977_s17 = sphi %s1031_s17, %s1324_s17   ;;  %s973_s16 = sphi %s1029_s16, %s1323_s16   ;;  %s969_s15 = sphi %s1027_s15, %s1322_s15  }
   0xb   : > { %s679_s22 = sadd.s32 4294967294, %s989_s20   ;;  %p57_p0 = scmp.ne.s32.totalorder %s973_s16, %s969_s15 }
   0xc   : > { %p1295_p1 = scmp.eq.s32.totalorder %s1058_s21, 0  ;;  %p161_p3 = scmp.eq.s32.totalorder %s679_s22, 1 }
   0xd   : > { %p680_p5 = scmp.ge.s32.totalorder %s989_s20, 1  ;;  %p168_p7 = scmp.lt.s32.totalorder %s989_s20, 3 }
   0xe   : > { %p1067_p4 = por %p1295_p1, %p57_p0  ;;  %p1072_p6 = por %p161_p3, %p57_p0 }
   0xf   : > { %p1077_p8 = pnand %p680_p5, %p168_p7  ;;  %s991_s26 = smov [#allocation8]  }
  0x10   : > { %s1303_s23 = scalar_select %p1067_p4, 1, 0 }
  0x11   : > { %s1304_s24 = scalar_select %p1072_p6, 1, 0 }
  0x12   : > { %s1305_s25 = scalar_select %p1077_p8, 1, 0 }
  0x13   : > { %s180_s27 = sshll.u32 %s991_s26, 4  ;;  %p734_p9 = pneg %p1077_p8  ;;  %s181_s27 = int_to_ptr.vmem [resolvable:$true] %s180_s27 }
  0x14   : > { %s35_s29 = sadd.s32 1, %s985_s19  ;;  %s1307_s2 = sld [smem:[#allocation16_spill]] }
  0x15   : > { %p1086_p11 = pnand %p734_p9, %p1295_p1 }
  0x17   : > { %p812_p13 = pneg %p1086_p11 }
  0x1a   : > { %s810_s6 = scalar_lea.hbm %s1307_s2, 384 }
  0x1b   : > { %p811_p12 = scmp.ne.s32.totalorder %s1307_s2, %s810_s6  ;;  %p817_p5 = scmp.lt.u32.totalorder %s810_s6, %s1307_s2 }
  0x1d   : > { %p813_p0 = pnand %p812_p13, %p811_p12 }
  0x1f   : > { %p814_p3 = pneg %p813_p0 }
  0x21   : > { %p819_p7 = pnand %p817_p5, %p814_p3 }
  0x23   : > { %822 = shalt.err (!%p819_p7)
}
  0x24   : > { %s823_s11 = scalar_lea.vmem %s181_s27, 384  ;;  %p831_p2 = scmp.lt.s32.totalorder %s181_s27, %s181_s27 }
  0x25   : > { %p824_p9 = scmp.ne.s32.totalorder %s181_s27, %s823_s11  ;;  %p832_p6 = scmp.lt.s32.totalorder %s823_s11, %s823_s11 }
  0x27   : > { %p826_p10 = pnand %p824_p9, %p812_p13  ;;  %p833_p4 = por %p832_p6, %p831_p2 }
  0x29   : > { %p827_p1 = pneg %p826_p10 }
  0x2b   : > { %p834_p8 = pnand %p833_p4, %p827_p1 }
  0x2d   : > { %837 = shalt.err (!%p834_p8)
}
  0x2e   : > { %s992_s12 = smov 128   ;;  %s993_s13 = smov 8  }
  0x2f   : > { %737 = dma.hbm_to_vmem [thread:$0]  (!%p1086_p11), %s1307_s2, 384, %s181_s27, [#allocation7], %s992_s12, %s992_s12, %s993_s13  }
  0x30   : > { %p37_p1 = scmp.ge.s32.totalorder %s35_s29, 2  ;;  %s44_s26 = sadd.s32 1, %s977_s17 }
  0x31   : > { %p51_p2 = scmp.ne.s32.totalorder %s977_s17, %s973_s16  ;;  %p52_p4 = scmp.eq.s32.totalorder %s989_s20, 0 }
  0x32   : > { %s1326_s29 = smov (%p37_p1, %s35_s29), 0  ;;  %p1310_p8 = scmp.eq.s32.totalorder %s1058_s21, 1 }
  0x33   : > { %1308 = sst [smem:[#allocation15_spill]] %s1326_s29  ;;  %p1113_p6 = por %p52_p4, %p51_p2 }
  0x34   : > { %p1119_p10 = por %p1310_p8, %p51_p2  ;;  %s39_s5 = ssub.s32 %s985_s19, %s1326_s29 }
  0x35   : > { %p750_p11 = scmp.lt.s32.totalorder %s989_s20, 2  ;;  %p42_p12 = scmp.eq.s32.totalorder %s39_s5, 0 }
  0x36   : > { %s1311_s28 = scalar_select %p1119_p10, 1, 0 }
  0x37   : > { %s197_s27 = sand.u32 1, %s977_s17   ;;  %s701_s8 = sshll.u32 %s985_s19, 8 }
  0x38   : > { %s1127_s6 = sshll.u32 %s197_s27, 3  ;;  %s1136_s11 = scalar_lea.hbm %s1290_s0, %s701_s8 }
  0x39   : > { %s1130_s7 = scalar_select %p42_p12, %s977_s17, %s44_s26  }
  0x3a   : > { %s201_s12 = scalar_lea.vmem [#allocation3], %s1127_s6  ;;  %p1143_p13 = pnand %p750_p11, %p1113_p6 }
  0x3b   : > { %s210_s13 = sshll.u32 %s201_s12, 4  ;;  %s1150_s5 = scalar_lea.hbm %s1291_s1, %s701_s8  ;;  %s1139_s13 = int_to_ptr.vmem [resolvable:$true] %s210_s13 }
  0x3c   : > { %s217_s9 = sand.u32 1, %s989_s20   ;;  %s198_s10 = scalar_lea.sflag [#allocation4], %s197_s27 }
  0x3d   : > { %s838_s2 = scalar_lea.hbm %s1136_s11, 128  ;;  %p840_p3 = pneg %p1143_p13 }
  0x3e   : > { %p839_p0 = scmp.ne.s32.totalorder %s1136_s11, %s838_s2  ;;  %s843_s29 = scalar_lea.hbm %s1290_s0, 512 }
  0x3f   : > { %p844_p9 = scmp.lt.u32.totalorder %s1136_s11, %s1290_s0  ;;  %p845_p1 = scmp.lt.u32.totalorder %s843_s29, %s838_s2 }
  0x40   : > { %p841_p5 = pnand %p840_p3, %p839_p0  ;;  %p847_p4 = scmp.lt.u32.totalorder %s838_s2, %s1136_s11 }
  0x41   : > { %p846_p2 = por %p845_p1, %p844_p9 }
  0x42   : > { %p842_p7 = pneg %p841_p5 }
  0x43   : > { %p848_p6 = por %p847_p4, %p846_p2 }
  0x45   : > { %p849_p8 = pnand %p848_p6, %p842_p7 }
  0x47   : > { %852 = shalt.err (!%p849_p8)
}
  0x48   : > { %s853_s27 = scalar_lea.vmem %s1139_s13, 128  ;;  %s994_s8 = smov [#allocation3]  }
  0x49   : > { %p854_p11 = scmp.ne.s32.totalorder %s1139_s13, %s853_s27  ;;  %s858_s26 = sshll.u32 %s994_s8, 4  ;;  %s859_s26 = int_to_ptr.vmem [resolvable:$false] %s858_s26 }
  0x4a   : > { %s860_s19 = scalar_lea.vmem %s859_s26, 256  ;;  %p861_p5 = scmp.lt.s32.totalorder %s1139_s13, %s859_s26 }
  0x4b   : > { %p856_p12 = pnand %p854_p11, %p840_p3  ;;  %p862_p9 = scmp.lt.s32.totalorder %s860_s19, %s853_s27 }
  0x4d   : > { %p857_p0 = pneg %p856_p12  ;;  %p863_p1 = por %p862_p9, %p861_p5 }
  0x4f   : > { %p864_p2 = pnand %p863_p1, %p857_p0 }
  0x51   : > { %867 = shalt.err (!%p864_p2)
}
  0x52   : > { %741 = dma.hbm_to_vmem [thread:$0]  (!%p1143_p13), %s1136_s11, 128, %s1139_s13, %s198_s10  }
  0x53   : > { %s1179_s2 = scalar_lea.hbm %s1150_s5, 128  ;;  %s221_s29 = scalar_lea.vmem [#allocation6], %s1127_s6 }
  0x54   : > { %s231_s30 = sshll.u32 %s221_s29, 4  ;;  %s218_s12 = scalar_lea.sflag [#allocation7], %s217_s9  ;;  %s232_s30 = int_to_ptr.vmem [resolvable:$true] %s231_s30 }
  0x55   : > { %s898_s22 = scalar_lea.hbm %s1150_s5, 256  ;;  %s873_s11 = scalar_lea.hbm %s1291_s1, 512 }
  0x56   : > { %p869_p7 = scmp.ne.s32.totalorder %s1179_s2, %s898_s22  ;;  %p874_p8 = scmp.lt.u32.totalorder %s1179_s2, %s1291_s1 }
  0x57   : > { %p875_p11 = scmp.lt.u32.totalorder %s873_s11, %s898_s22  ;;  %p877_p0 = scmp.lt.u32.totalorder %s898_s22, %s1179_s2 }
  0x58   : > { %p871_p4 = pnand %p869_p7, %p840_p3 }
  0x59   : > { %p876_p12 = por %p875_p11, %p874_p8 }
  0x5a   : > { %p872_p6 = pneg %p871_p4 }
  0x5b   : > { %p878_p5 = por %p877_p0, %p876_p12 }
  0x5d   : > { %p879_p9 = pnand %p878_p5, %p872_p6 }
  0x5f   : > { %882 = shalt.err (!%p879_p9)
}
  0x60   : > { %s883_s6 = scalar_lea.vmem %s232_s30, 128  ;;  %s995_s5 = smov [#allocation6]  }
  0x61   : > { %p884_p1 = scmp.ne.s32.totalorder %s232_s30, %s883_s6  ;;  %s888_s9 = sshll.u32 %s995_s5, 4  ;;  %s889_s9 = int_to_ptr.vmem [resolvable:$false] %s888_s9 }
  0x62   : > { %s890_s26 = scalar_lea.vmem %s889_s9, 256  ;;  %p891_p4 = scmp.lt.s32.totalorder %s232_s30, %s889_s9 }
  0x63   : > { %p886_p2 = pnand %p884_p1, %p840_p3  ;;  %p892_p10 = scmp.lt.s32.totalorder %s890_s26, %s883_s6 }
  0x65   : > { %p887_p7 = pneg %p886_p2  ;;  %p893_p8 = por %p892_p10, %p891_p4 }
  0x67   : > { %p894_p11 = pnand %p893_p8, %p887_p7 }
  0x69   : > { %897 = shalt.err (!%p894_p11)
}
  0x6a   : > { %744 = dma.hbm_to_vmem [thread:$0]  (!%p1143_p13), %s1179_s2, 128, %s232_s30, %s218_s12  }
  0x6b   : > { %p1313_p6 = scmp.ne.s32.totalorder %s1305_s25, 0 }
  0x6c   : > { %s1206_s19 = sand.u32 (!%p1313_p6), 1, %s973_s16   ;;  %p1314_p10 = scmp.ne.s32.totalorder (!%p1313_p6), %s1303_s23, 0 }
  0x6d   : > { %240 = sbr.rel (%p1313_p6) target bundleno = 482 (0x1e2), region = 36  ;;  %s1209_s29 = sshll.u32 (!%p1313_p6), %s1206_s19, 3 }
  0x6e   : > { %s243_s22 = scalar_lea.sflag (!%p1313_p6), [#allocation4], %s1206_s19  ;;  %s246_s27 = scalar_lea.vmem (!%p1313_p6), [#allocation3], %s1209_s29 }
  0x74   : > { %952 = dma.done.wait (%p1314_p10), %s243_s22, 128  }
  0x75   : > { %954 = vsyncadd (%p1314_p10), %s243_s22, 4294967168  ;;  %s251_s25 = sand.u32 1, %s1058_s21   ;;  %s255_s2 = scalar_lea.vmem [#allocation6], %s1209_s29 }
  0x76   : > { %s252_s14 = scalar_lea.sflag [#allocation7], %s251_s25 }
  0x77   : > { %956 = dma.done.wait (%p1314_p10), %s252_s14, 128  }
  0x78   : > { %958 = vsyncadd (%p1314_p10), %s252_s14, 4294967168  ;;  %p1315_p13 = scmp.eq.s32.totalorder %s1058_s21, 0 }
  0x7a   : > { %960 = dma.done.wait (%p1315_p13), [#allocation7], 384   ;;  %p1316_p3 = pmov %p1315_p13 }
  0x7b   : > { %v996_v0 = vmov 0.0   ;;  %vm997_vm0 = vmmov 0   ;;  %v998_v1 = vmov 0   ;;  %v290_v2 = vld [vmem:[%s246_s27] sm:$0xff]  ;;  %vm309_vm1 = vcmask 64512   ;;  %s999_s23 = smov 126  }
  0x7c   : > { %962 = vsyncadd (%p1316_p3), [#allocation7], 4294966912  ;;  %709 = vmatprep.subr.mxu0 %v996_v0  ;;  %714 = vmatprep.subr.mxu1 %v996_v0  ;;  %s1000_s30 = smov 127   ;;  %v295_v3 = vld [vmem:[#allocation8] sm:$0xff]  ;;  %v292_v4 = vld [vmem:[%s255_s2] sm:$0xff]  ;;  %vm306_vm2 = vcmask 1039360  }
  0x7d   : > { %711 = vmatprep.mubr.msk.f32.mxu0 %vm997_vm0, %v996_v0  ;;  %716 = vmatprep.mubr.msk.f32.mxu1 %vm997_vm0, %v996_v0  ;;  %v539_v5 = vld [vmem:[%s1293_s3] sm:$0xff]  ;;  %vm462_vm3 = vcmask 1031168   ;;  %v299_v10 = vld [vmem:[#allocation8 + $0x8] sm:$0xff]  ;;  %v457_v13 = vld [vmem:[#allocation8 + $0x10] sm:$0xff]  ;;  %s698_s8 = sshll.u32 %s981_s18, 7  ;;  %s288_s11 = scalar_lea.vmem [#allocation9], %s1209_s29 }
  0x7e   : > { %809 = vset.pattern.permute.xlu0 %v998_v1  ;;  %458 = vrot.lane.b32.xlu1 %v290_v2, %s999_s23  ;;  %s562_s13 = sshll.u32 %s288_s11, 4  ;;  %s1241_s5 = scalar_lea.hbm %s1294_s4, %s698_s8  ;;  %s1243_s13 = int_to_ptr.vmem [resolvable:$true] %s562_s13 }
  0x7f   : > { %302 = vrot.lane.b32.xlu0 %v290_v2, %s1000_s30  ;;  %715 = vmatpush3.msra.mxu1 %v290_v2  ;;  %s548_s9 = scalar_lea.sflag [#allocation5], %s1206_s19  ;;  %s899_s26 = scalar_lea.vmem %s1243_s13, 128 }
  0x80   : > { %717 = vmatmul.mubr.msk.f32.vlgmr.msra.gmra.mrb[0].mxu1 %vm309_vm1, %v295_v3  ;;  %p900_p12 = scmp.ne.s32.totalorder %s1243_s13, %s899_s26  ;;  %p1317_p0 = scmp.ne.s32.totalorder %s1311_s28, 0 }
  0x81   : > { %s1001_s18 = smov [#allocation9]  }
  0x82   : > { %460 = vrot.lane.b32.xlu1 %v292_v4, %s999_s23  ;;  %p901_p5 = pnand %p900_p12, %p1317_p0  ;;  %s903_s29 = sshll.u32 %s1001_s18, 4  ;;  %s904_s29 = int_to_ptr.vmem [resolvable:$false] %s903_s29 }
  0x83   : > { %304 = vrot.lane.b32.xlu0 %v292_v4, %s1000_s30  ;;  %s905_s22 = scalar_lea.vmem %s904_s29, 256  ;;  %p906_p1 = scmp.lt.s32.totalorder %s1243_s13, %s904_s29 }
  0x84   : > { %p902_p9 = pneg %p901_p5  ;;  %p907_p2 = scmp.lt.s32.totalorder %s905_s22, %s899_s26 }
  0x86   : > { %p908_p7 = por %p907_p2, %p906_p1 }
  0x87   : > { %542 = vperm.xlu0 %809, %v539_v5  }
  0x88   : > { %p909_p4 = pnand %p908_p7, %p902_p9 }
  0xf0   : > { %v459_v6 = vpop.permute.xlu1 %458 }
  0xf1   : > { %v303_v7 = vpop.permute.xlu0 %302 }
  0xf4   : > { %v461_v8 = vpop.permute.xlu1 %460 }
  0xf5   : > { %v305_v9 = vpop.permute.xlu0 %304  ;;  %v463_v12 = vsel %vm462_vm3, %v459_v6, %v461_v8 }
  0xf6   : > { %v307_v11 = vsel %vm306_vm2, %v303_v7, %v305_v9 }
  0xf7   : > { %710 = vmatpush3.msra.mxu0 %v307_v11 }
  0xf8   : > { %712 = vmatmul.mubr.msk.f32.vlgmr.msra.gmra.mrb[0].mxu0 %vm309_vm1, %v299_v10  ;;  %719 = vmatprep.subr.mxu0 %v996_v0 }
  0xf9   : > { %720 = vmatpush3.msra.mxu0 %v463_v12  ;;  %721 = vmatprep.mubr.msk.f32.mxu0 %vm997_vm0, %v996_v0 }
  0xfc   : > { %722 = vmatmul.mubr.msk.f32.vlgmr.msra.gmra.mrb[2].mxu0 %vm309_vm1, %v457_v13 }
 0x106   : > { %v543_v20 = vpop.permute.xlu0 %542 }
 0x153   : > { %v452_v14 = vpop.f32.mrb[0].mxu1 }
 0x154   : > { %v718_v15 = vpop.f32.mrb[1].mxu1 }
 0x1cb   : > { %v379_v16 = vpop.f32.mrb[0].mxu0 }
 0x1cc   : > { %v713_v17 = vpop.f32.mrb[1].mxu0  ;;  %v453_v18 = vadd.f32 %v452_v14, %v379_v16 }
 0x1cf   : > { %v534_v19 = vpop.f32.mrb[2].mxu0 }
 0x1d0   : > { %v538_v21 = vadd.f32 %v534_v19, %v453_v18  ;;  %v723_v22 = vpop.f32.mrb[3].mxu0 }
 0x1d2   : > { %v545_v23 = vadd.f32 %v543_v20, %v538_v21 }
 0x1d4   : > { %546 = vst [vmem:[%s288_s11] sm:$0xff] %v545_v23 }
 0x1d5   : > { %912 = shalt.err (!%p909_p4)
}
 0x1d6   : > { %s913_s19 = scalar_lea.hbm %s1241_s5, 128  ;;  %s917_s14 = scalar_lea.hbm %s1294_s4, 256 }
 0x1d7   : > { %p914_p8 = scmp.ne.s32.totalorder %s1241_s5, %s913_s19  ;;  %p918_p10 = scmp.lt.u32.totalorder %s1241_s5, %s1294_s4 }
 0x1d8   : > { %p919_p13 = scmp.lt.u32.totalorder %s917_s14, %s913_s19  ;;  %p921_p12 = scmp.lt.u32.totalorder %s913_s19, %s1241_s5 }
 0x1d9   : > { %p915_p11 = pnand %p914_p8, %p1317_p0 }
 0x1da   : > { %p920_p3 = por %p919_p13, %p918_p10 }
 0x1db   : > { %p916_p6 = pneg %p915_p11 }
 0x1dc   : > { %p922_p5 = por %p921_p12, %p920_p3 }
 0x1de   : > { %p923_p9 = pnand %p922_p5, %p916_p6 }
 0x1e0   : > { %926 = shalt.err (!%p923_p9)
}
 0x1e1   : > { %732 = dma.vmem_to_hbm [thread:$0]  (%p1317_p0), %s1243_s13, 128, %s1241_s5, %s548_s9  }
 0x1e2 PF: > { %s574_s30 = sand.u32 1, %s969_s15   ;;  %p1318_p1 = scmp.ne.s32.totalorder %s1304_s24, 0 }
 0x1e3   : > { %p1319_p2 = scmp.ge.s32.totalorder %s989_s20, 2  ;;  %s575_s21 = scalar_lea.sflag [#allocation5], %s574_s30 }
 0x1e5   : > { %p746_p7 = pnand %p1319_p2, %p1318_p1 }
 0x1e7   : > { %964 = dma.done.wait (!%p746_p7), %s575_s21, 128  }
 0x1e8   : > { %966 = vsyncadd (!%p746_p7), %s575_s21, 4294967168  ;;  %s23_s20 = sadd.s32 1, %s989_s20   ;;  %s1320_s18 = sld [smem:[#allocation14_spill]] }
 0x1e9   : > { %p20_p4 = scmp.ge.s32.totalorder %s23_s20, 4   ;;  %s1321_s19 = sld [smem:[#allocation15_spill]] }
 0x1ea   : > { %s1322_s15 = smov %s973_s16  ;;  %s1323_s16 = smov %s977_s17 }
 0x1eb   : > { %s1324_s17 = smov %s1130_s7  ;;  %22 = sbr.rel (!%p20_p4) target bundleno = 10 (0xa), region = 100 }
 0x1f2   :  { %580 = vsyncpa [#allocation4], 1 }
 0x1f3   :  { %582 = vsyncpa [#allocation4 + $0x1], 1 }
 0x1f4   :  { %583 = vsyncpa [#allocation7], 1 }
 0x1f5   :  { %585 = vsyncpa [#allocation7 + $0x1], 1 }
 0x1f6   :  { %586 = vsyncpa [#allocation5], 1 }
 0x1f7   :  { %588 = vsyncpa [#allocation5 + $0x1], 1 }

</bundles_post_ra>
